<compile_context>
chip_gen: v7x
topology: tpu7x:2x2x1
jax: 0.10.0
libtpu: 0.0.40
codegen_flags: <defaults>
</compile_context>

<pallas_src>
import jax
import jax.numpy as jnp
from jax import lax
from jax.experimental import pallas as pl
from jax.experimental.pallas import tpu as pltpu


def _round_up(a: int, b: int) -> int:
    return ((a + b - 1) // b) * b


def _svdd_kernel(x_ref, y_ref, c_ref, loss_ref):
    """One batch tile.

    x_ref:    (TB, D) features (last tile may contain out-of-bounds garbage rows)
    y_ref:    (1, TB) int32 labels, lane-dense (padded / OOB rows carry -1)
    c_ref:    (1, D)  f32 center (same block every grid step -> resident)
    loss_ref: (1, TB) f32 per-sample loss, lane-dense
    """
    x = x_ref[...]
    if x.dtype != jnp.float32:
        x = x.astype(jnp.float32)
    c = c_ref[...]                                   # already float32

    diff = x - c                                     # (TB, D)  VPU
    sq = diff * diff                                 # (TB, D)  VPU

    # Row-wise sum via the idle MXU: ones(1, D) contracted with sq(TB, D) over D
    # yields (1, TB) directly in the lane-dense output layout.
    ones = jnp.ones((1, sq.shape[1]), dtype=jnp.float32)
    row_sq = lax.dot_general(
        ones, sq,
        dimension_numbers=(((1,), (1,)), ((), ())),
        precision=lax.Precision.HIGHEST,
        preferred_element_type=jnp.float32)          # (1, TB)

    known = y_ref[...] >= 0                          # (1, TB) bool; OOB rows -> False
    loss_ref[...] = jnp.where(known, row_sq, 0.0)


def _choose_block_rows(n: int, d: int, target: int = 1024,
                       x_budget_bytes: int = 16 << 20) -> int:
    """Rows per tile: multiple of 128 (lane-dense y/loss blocks) and of 8
    (x sublanes), sized so the double-buffered f32 x tile fits the budget."""
    per_row_bytes = 2 * d * 4                         # double-buffered f32 row
    max_rows = max(128, (x_budget_bytes // per_row_bytes) // 128 * 128)
    tb = min(target, max_rows)
    if n <= tb:
        tb = min(_round_up(max(n, 1), 128), max_rows)
    return tb


def deep_svdd_loss(x, y, center, reduction="mean"):
    """Mirrors DeepSVDDLoss.forward(x, y)."""
    n, d = x.shape
    center = jnp.asarray(center, dtype=jnp.float32).reshape(1, d)

    tb = _choose_block_rows(n, d)
    num_tiles = pl.cdiv(n, tb)
    n_pad = num_tiles * tb

    # Only the (tiny) label vector is padded; x stays untouched in HBM.
    y_lane = jnp.pad(y.astype(jnp.int32), (0, n_pad - n),
                     constant_values=-1).reshape(1, n_pad)

    loss = pl.pallas_call(
        _svdd_kernel,
        out_shape=jax.ShapeDtypeStruct((1, n_pad), jnp.float32),
        grid=(num_tiles,),
        in_specs=[
            pl.BlockSpec((tb, d), lambda i: (i, 0)),   # x tile (double-buffered)
            pl.BlockSpec((1, tb), lambda i: (0, i)),   # labels, lane-dense
            pl.BlockSpec((1, d), lambda i: (0, 0)),    # center (same block every step)
        ],
        out_specs=pl.BlockSpec((1, tb), lambda i: (0, i)),
        compiler_params=pltpu.CompilerParams(
            dimension_semantics=("parallel",),
            vmem_limit_bytes=32 * 1024 * 1024,
        ),
        cost_estimate=pl.CostEstimate(
            flops=3 * n * d,
            transcendentals=0,
            bytes_accessed=4 * n * d + 2 * 4 * n_pad + 4 * d,
        ),
    )(x, y_lane, center)

    if reduction == "mean":
        # Padded / unknown entries are exactly zero; divide by the TRUE batch size.
        return jnp.sum(loss) / n
    elif reduction == "sum":
        return jnp.sum(loss)
    else:  # None -> per-sample losses, shape (N,)
        return loss[0, :n]


if __name__ == "__main__":
    key = jax.random.PRNGKey(0)

    # Small demo shape consistent with the module: feature matrix [batch, n_features].
    batch, n_features = 8, 32
    kx, _ = jax.random.split(key)
    x = jax.random.normal(kx, (batch, n_features), dtype=jnp.float32)
    # Labels: y >= 0 -> known (IN), y < 0 -> OOD (masked to zero loss).
    y = jnp.array([0, 1, -1, 2, 0, -1, 3, 1], dtype=jnp.int32)
    # ClassCenters(1, n_features, fixed=True) initializes the center to zeros.
    center = jnp.zeros((1, n_features), dtype=jnp.float32)

    out = deep_svdd_loss(x, y, center, reduction="mean")
    jax.block_until_ready(out)

    ref = jnp.mean(jnp.where(y >= 0, jnp.sum((x - center) ** 2, axis=-1), 0.0))
    assert jnp.allclose(out, ref, rtol=1e-4, atol=1e-4)

    # Per-sample (reduction=None) path.
    out_none = deep_svdd_loss(x, y, center, reduction=None)
    jax.block_until_ready(out_none)
    ref_none = jnp.where(y >= 0, jnp.sum((x - center) ** 2, axis=-1), 0.0)
    assert out_none.shape == (batch,)
    assert jnp.allclose(out_none, ref_none, rtol=1e-4, atol=1e-4)

    # Multi-tile + ragged-tail path (exercises tiling, OOB rows and masking).
    k2, k3 = jax.random.split(kx)
    n2, d2 = 2500, 256
    x2 = jax.random.normal(k2, (n2, d2), dtype=jnp.float32)
    y2 = jax.random.randint(k3, (n2,), -1, 5, dtype=jnp.int32)
    c2 = jax.random.normal(key, (1, d2), dtype=jnp.float32)
    out2 = deep_svdd_loss(x2, y2, c2, reduction="mean")
    jax.block_until_ready(out2)
    ref2 = jnp.mean(jnp.where(y2 >= 0, jnp.sum((x2 - c2) ** 2, axis=-1), 0.0))
    assert jnp.allclose(out2, ref2, rtol=1e-4, atol=1e-3)

    print("KERNEL_OK")
</pallas_src>

<mosaic_0001>
module attributes {stable_mosaic.version = 11 : i64} {
  func.func @_svdd_kernel(%arg0: i32, %arg1: memref<128x32xf32, #tpu.memory_space<vmem>>, %arg2: memref<1x128xi32, #tpu.memory_space<vmem>>, %arg3: memref<1x32xf32, #tpu.memory_space<vmem>>, %arg4: memref<1x128xf32, #tpu.memory_space<vmem>>) attributes {dimension_semantics = [#tpu.dimension_semantics<parallel>], iteration_bounds = array<i64: 1>, scalar_prefetch = 0 : i64, scratch_operands = 0 : i64, tpu.core_type = #tpu.core_type<tc>, window_params = [{transform_indices = @transform_0, window_bounds = array<i64: 128, 32>}, {transform_indices = @transform_1, window_bounds = array<i64: 1, 128>}, {pipeline_mode = #tpu.pipeline_mode<synchronous>, transform_indices = @transform_2, window_bounds = array<i64: 1, 32>}, {transform_indices = @transform_3, window_bounds = array<i64: 1, 128>}]} {
    %c0 = arith.constant 0 : index
    %c0_0 = arith.constant 0 : index
    %0 = vector.load %arg1[%c0, %c0_0] : memref<128x32xf32, #tpu.memory_space<vmem>>, vector<128x32xf32>
    %c0_1 = arith.constant 0 : index
    %c0_2 = arith.constant 0 : index
    %1 = vector.load %arg3[%c0_1, %c0_2] : memref<1x32xf32, #tpu.memory_space<vmem>>, vector<1x32xf32>
    %2 = vector.broadcast %1 : vector<1x32xf32> to vector<128x32xf32>
    %3 = arith.subf %0, %2 : vector<128x32xf32>
    %4 = arith.mulf %3, %3 : vector<128x32xf32>
    %cst = arith.constant 1.000000e+00 : f32
    %5 = vector.broadcast %cst : f32 to vector<1x32xf32>
    %cst_3 = arith.constant dense<0.000000e+00> : vector<1x128xf32>
    %6 = tpu.matmul %5, %4, %cst_3 {dimension_numbers = #tpu.dot_dimension_numbers<[1], [1], [0], [0], [0, 0, 1, 0], [], []>, precision = #tpu.contract_precision<fp32>} : vector<1x32xf32>, vector<128x32xf32>, vector<1x128xf32> -> vector<1x128xf32>
    %c0_4 = arith.constant 0 : index
    %c0_5 = arith.constant 0 : index
    %7 = vector.load %arg2[%c0_4, %c0_5] : memref<1x128xi32, #tpu.memory_space<vmem>>, vector<1x128xi32>
    %c0_i32 = arith.constant 0 : i32
    %8 = vector.broadcast %c0_i32 : i32 to vector<1x128xi32>
    %9 = arith.cmpi sge, %7, %8 : vector<1x128xi32>
    %cst_6 = arith.constant 0.000000e+00 : f32
    %10 = vector.broadcast %cst_6 : f32 to vector<1x128xf32>
    %11 = arith.select %9, %6, %10 : vector<1x128xi1>, vector<1x128xf32>
    %c0_7 = arith.constant 0 : index
    %c0_8 = arith.constant 0 : index
    %12 = vector.load %arg4[%c0_7, %c0_8] : memref<1x128xf32, #tpu.memory_space<vmem>>, vector<1x128xf32>
    tpu.vector_store %arg4[%c0_7, %c0_8], %11 {strides = array<i32>} : memref<1x128xf32, #tpu.memory_space<vmem>>, vector<1x128xf32>,
    return
  }
  func.func @transform_0(%arg0: i32) -> (i32, i32) {
    %c0_i32 = arith.constant 0 : i32
    %c0_i32_0 = arith.constant 0 : i32
    return %arg0, %c0_i32 : i32, i32
  }
  func.func @transform_1(%arg0: i32) -> (i32, i32) {
    %c0_i32 = arith.constant 0 : i32
    %c0_i32_0 = arith.constant 0 : i32
    return %c0_i32, %arg0 : i32, i32
  }
  func.func @transform_2(%arg0: i32) -> (i32, i32) {
    %c0_i32 = arith.constant 0 : i32
    %c0_i32_0 = arith.constant 0 : i32
    %c0_i32_1 = arith.constant 0 : i32
    return %c0_i32, %c0_i32_0 : i32, i32
  }
  func.func @transform_3(%arg0: i32) -> (i32, i32) {
    %c0_i32 = arith.constant 0 : i32
    %c0_i32_0 = arith.constant 0 : i32
    return %c0_i32, %arg0 : i32, i32
  }
}

</mosaic_0001>

<bundles_post_ra>
// kernel: tpu_custom_call.1
= control target key start
LH: loop header
LB: loop body
LE: loop exit
PB: predicated region body
PF: predicated region fallthrough
CT: control target
= control target key end

     0   :  { %8 = vsyncpa [#allocation3], 0  ;;  %s1628_s0 = inlined_call_operand.hbm [shape: f32[8,32], index: 0, kind: input, shape index: {}]   ;;  %s1629_s1 = inlined_call_operand.vmem [shape: s32[1,128], index: 1, kind: input, shape index: {}]   ;;  %s1630_s2 = inlined_call_operand.vmem [shape: f32[1,32], index: 2, kind: input, shape index: {}]   ;;  %s1631_s3 = inlined_call_operand.hbm [shape: f32[1,128], index: 3, kind: output, shape index: {}]  }
   0x1   :  { %9 = vsyncpa [#allocation4], 0 }
   0x2   :  { %14 = vsyncadd [#allocation3], 1920  ;;  %s1322_s12 = smov [#allocation2]   ;;  %s1274_s16 = scalar_lea.hbm %s1628_s0, 128 }
   0x3   :  { %s15_s13 = sshll.u32 %s1322_s12, 4  ;;  %p1275_p0 = scmp.ne.s32.totalorder %s1628_s0, %s1274_s16  ;;  %s16_s13 = int_to_ptr.vmem [resolvable:$true] %s15_s13 }
   0x4   :  { %p1278_p1 = scmp.lt.u32.totalorder %s1274_s16, %s1628_s0 }
   0x6   :  { %p1280_p2 = pnand %p1278_p1, %p1275_p0 }
   0x8   :  { %1283 = shalt.err (!%p1280_p2)
}
   0x9   :  { %s1284_s21 = scalar_lea.vmem %s16_s13, 128  ;;  %s1288_s22 = scalar_lea.vmem %s16_s13, 2048 }
   0xa   :  { %p1285_p3 = scmp.ne.s32.totalorder %s16_s13, %s1284_s21  ;;  %p1289_p4 = scmp.lt.s32.totalorder %s16_s13, %s16_s13 }
   0xb   :  { %p1290_p5 = scmp.lt.s32.totalorder %s1288_s22, %s1284_s21 }
   0xd   :  { %p1291_p6 = por %p1290_p5, %p1289_p4 }
   0xf   :  { %p1292_p7 = pnand %p1291_p6, %p1285_p3 }
  0x11   :  { %1295 = shalt.err (!%p1292_p7)
}
  0x12   :  { %s1323_s23 = smov 128   ;;  %s1324_s24 = smov 8  }
  0x13   :  { %21 = dma.hbm_to_vmem [thread:$0]  %s1628_s0, 128, %s16_s13, [#allocation3], %s1323_s23, %s1323_s23, %s1324_s24  }
  0x14   :  { %1318 = dma.done.wait [#allocation3], 2048  }
  0x15   :  { %1319 = vsyncadd [#allocation3], 4294965248  ;;  %v1325_v0 = vmov 0.0|0.0   ;;  %vm1326_vm0 = vmmov 0   ;;  %v1327_v1 = vmov 0.0   ;;  %v29_v2 = vld [vmem:[#allocation2] sm:$0xff] }
  0x16   :  { %1112 = vmatprep.subr.bf16.mxu1 %v1325_v0  ;;  %1184 = vmatprep.subr.bf16.mxu0 %v1325_v0  ;;  %v30_v3 = vld [vmem:[#allocation2 + $0x8] sm:$0xff]  ;;  %v1372_v4 = vld [vmem:[%s1630_s2] ss:$0 sm:$0xff]  ;;  %v31_v7 = vld [vmem:[#allocation2 + $0x10] sm:$0xff]  ;;  %vm84_vm1 = vcmask 261120   ;;  %s1330_s29 = smov [#allocation5]  }
  0x17   :  { %934 = vmatprep.mubr.msk.f32.mxu1 %vm1326_vm0, %v1327_v1  ;;  %1039 = vmatprep.mubr.msk.f32.mxu0 %vm1326_vm0, %v1327_v1  ;;  %v52_v5 = vsub.f32 %v29_v2, %v1372_v4  ;;  %v53_v6 = vsub.f32 %v30_v3, %v1372_v4  ;;  %v32_v8 = vld [vmem:[#allocation2 + $0x18] sm:$0xff]  ;;  %v54_v9 = vsub.f32 %v31_v7, %v1372_v4  ;;  %v33_v15 = vld [vmem:[#allocation2 + $0x20] sm:$0xff]  ;;  %v34_v16 = vld [vmem:[#allocation2 + $0x28] sm:$0xff]  ;;  %s787_s30 = sshll.u32 %s1330_s29, 4  ;;  %s788_s30 = int_to_ptr.vmem [resolvable:$true] %s787_s30 }
  0x18   :  { %v55_v10 = vsub.f32 %v32_v8, %v1372_v4  ;;  %v56_v23 = vsub.f32 %v33_v15, %v1372_v4  ;;  %v57_v24 = vsub.f32 %v34_v16, %v1372_v4  ;;  %v35_v30 = vld [vmem:[#allocation2 + $0x30] sm:$0xff]  ;;  %v36_v31 = vld [vmem:[#allocation2 + $0x38] sm:$0xff]  ;;  %v37_v41 = vld [vmem:[#allocation2 + $0x40] sm:$0xff]  ;;  %s1296_s4 = scalar_lea.vmem %s788_s30, 16  ;;  %s1300_s5 = scalar_lea.vmem %s788_s30, 32 }
  0x19   :  { %v68_v11 = vmul.f32 %v52_v5, %v52_v5  ;;  %v69_v12 = vmul.f32 %v53_v6, %v53_v6  ;;  %v70_v13 = vmul.f32 %v54_v9, %v54_v9  ;;  %v58_v35 = vsub.f32 %v35_v30, %v1372_v4  ;;  %v38_v42 = vld [vmem:[#allocation2 + $0x48] sm:$0xff]  ;;  %v39_v48 = vld [vmem:[#allocation2 + $0x50] sm:$0xff]  ;;  %v40_v49 = vld [vmem:[#allocation2 + $0x58] sm:$0xff]  ;;  %p1297_p8 = scmp.ne.s32.totalorder %s788_s30, %s1296_s4  ;;  %p1301_p9 = scmp.lt.s32.totalorder %s788_s30, %s788_s30 }
  0x1a   :  { %v71_v14 = vmul.f32 %v55_v10, %v55_v10  ;;  %v72_v28 = vmul.f32 %v56_v23, %v56_v23  ;;  %v73_v29 = vmul.f32 %v57_v24, %v57_v24  ;;  %v59_v36 = vsub.f32 %v36_v31, %v1372_v4  ;;  %v41_v61 = vld [vmem:[#allocation2 + $0x60] sm:$0xff]  ;;  %v42_v62 = vld [vmem:[#allocation2 + $0x68] sm:$0xff]  ;;  %v43_v31 = vld [vmem:[#allocation2 + $0x70] sm:$0xff]  ;;  %p1302_p10 = scmp.lt.s32.totalorder %s1300_s5, %s1296_s4 }
  0x1b   :  { %v89_v17 = vsel %vm84_vm1, %v68_v11, 0  ;;  %v92_v18 = vsel %vm84_vm1, %v69_v12, 0  ;;  %v95_v21 = vsel %vm84_vm1, %v70_v13, 0  ;;  %v74_v39 = vmul.f32 %v58_v35, %v58_v35 }
  0x1c   :  { %v137_v19 = vand.u32 4294901760, %v89_v17  ;;  %v140_v20 = vand.u32 4294901760, %v92_v18  ;;  %v98_v22 = vsel %vm84_vm1, %v71_v14, 0  ;;  %v143_v26 = vand.u32 4294901760, %v95_v21  ;;  %p1303_p11 = por %p1302_p10, %p1301_p9 }
  0x1d   :  { %v146_v27 = vand.u32 4294901760, %v98_v22  ;;  %v101_v33 = vsel %vm84_vm1, %v72_v28, 0  ;;  %v104_v34 = vsel %vm84_vm1, %v73_v29, 0  ;;  %v75_v40 = vmul.f32 %v59_v36, %v59_v36 }
  0x1e   :  { %v1384_v25 = vpack.c.bf16 %v140_v20, %v137_v19  ;;  %v149_v37 = vand.u32 4294901760, %v101_v33  ;;  %v152_v38 = vand.u32 4294901760, %v104_v34  ;;  %v107_v44 = vsel %vm84_vm1, %v74_v39, 0  ;;  %p1304_p12 = pnand %p1303_p11, %p1297_p8 }
  0x1f   :  { %v1390_v32 = vpack.c.bf16 %v146_v27, %v143_v26  ;;  %v110_v45 = vsel %vm84_vm1, %v75_v40, 0  ;;  %v60_v46 = vsub.f32 %v37_v41, %v1372_v4  ;;  %v61_v47 = vsub.f32 %v38_v42, %v1372_v4 }
  0x20   :  { %1114 = vmatpush3.bf16.xpose.msra.mxu1 %v1384_v25  ;;  %1186 = vmatpush3.bf16.xpose.msra.mxu0 %v1384_v25  ;;  %v1400_v43 = vpack.c.bf16 %v152_v38, %v149_v37  ;;  %v155_v50 = vand.u32 4294901760, %v107_v44  ;;  %v158_v51 = vand.u32 4294901760, %v110_v45  ;;  %v62_v54 = vsub.f32 %v39_v48, %v1372_v4 }
  0x21   :  { %1115 = vmatprep.subr.bf16.mxu1 %v1325_v0  ;;  %1187 = vmatprep.subr.bf16.mxu0 %v1325_v0  ;;  %v76_v52 = vmul.f32 %v60_v46, %v60_v46  ;;  %v77_v53 = vmul.f32 %v61_v47, %v61_v47  ;;  %v63_v55 = vsub.f32 %v40_v49, %v1372_v4 }
  0x22   :  { %v1412_v56 = vpack.c.bf16 %v158_v51, %v155_v50  ;;  %v78_v59 = vmul.f32 %v62_v54, %v62_v54  ;;  %v1416_v63 = vsub.f32 %v89_v17, %v137_v19  ;;  %v1418_v2 = vsub.f32 %v92_v18, %v140_v20 }
  0x23   :  { %v113_v57 = vsel %vm84_vm1, %v76_v52, 0  ;;  %v116_v58 = vsel %vm84_vm1, %v77_v53, 0  ;;  %v79_v60 = vmul.f32 %v63_v55, %v63_v55  ;;  %v1422_v6 = vsub.f32 %v95_v21, %v143_v26 }
  0x24   :  { %v161_v3 = vand.u32 4294901760, %v113_v57  ;;  %v164_v5 = vand.u32 4294901760, %v116_v58  ;;  %v1424_v7 = vsub.f32 %v98_v22, %v146_v27  ;;  %v1426_v8 = vsub.f32 %v101_v33, %v149_v37  ;;  %v44_v33 = vld [vmem:[#allocation2 + $0x78] sm:$0xff] }
  0x25   :  { %v119_v9 = vsel %vm84_vm1, %v78_v59, 0  ;;  %v122_v10 = vsel %vm84_vm1, %v79_v60, 0  ;;  %v64_v11 = vsub.f32 %v41_v61, %v1372_v4  ;;  %v65_v12 = vsub.f32 %v42_v62, %v1372_v4 }
  0x26   :  { %v1434_v13 = vsub.f32 %v104_v34, %v152_v38  ;;  %v1436_v14 = vsub.f32 %v107_v44, %v155_v50  ;;  %v1438_v15 = vsub.f32 %v110_v45, %v158_v51  ;;  %v1440_v16 = vsub.f32 %v113_v57, %v161_v3 }
  0x27   :  { %v1442_v17 = vpack.c.bf16 %v164_v5, %v161_v3  ;;  %v1444_v18 = vsub.f32 %v116_v58, %v164_v5  ;;  %v1161_v19 = vpack.c.bf16 %v1418_v2, %v1416_v63  ;;  %v1164_v20 = vpack.c.bf16 %v1424_v7, %v1422_v6 }
  0x28   :  { %1117 = vmatpush3.bf16.xpose.msra.mxu1 %v1390_v32  ;;  %1189 = vmatpush3.bf16.xpose.msra.mxu0 %v1390_v32  ;;  %v167_v21 = vand.u32 4294901760, %v119_v9  ;;  %v170_v22 = vand.u32 4294901760, %v122_v10  ;;  %v1167_v23 = vpack.c.bf16 %v1434_v13, %v1426_v8  ;;  %v80_v24 = vmul.f32 %v64_v11, %v64_v11 }
  0x29   :  { %1118 = vmatprep.subr.bf16.mxu1 %v1325_v0  ;;  %1190 = vmatprep.subr.bf16.mxu0 %v1325_v0  ;;  %v81_v26 = vmul.f32 %v65_v12, %v65_v12  ;;  %v1170_v27 = vpack.c.bf16 %v1438_v15, %v1436_v14  ;;  %v1173_v28 = vpack.c.bf16 %v1444_v18, %v1440_v16  ;;  %v1328_v50 = vmov 0  }
  0x2a   :  { %v1456_v29 = vsub.f32 %v119_v9, %v167_v21  ;;  %v1458_v30 = vsub.f32 %v122_v10, %v170_v22  ;;  %v125_v35 = vsel %vm84_vm1, %v80_v24, 0  ;;  %v66_v37 = vsub.f32 %v43_v31, %v1372_v4 }
  0x2b   :  { %v128_v36 = vsel %vm84_vm1, %v81_v26, 0  ;;  %v67_v38 = vsub.f32 %v44_v33, %v1372_v4  ;;  %v1470_v39 = vpack.c.bf16 %v170_v22, %v167_v21  ;;  %v173_v40 = vand.u32 4294901760, %v125_v35 }
  0x2c   :  { %v1176_v34 = vpack.c.bf16 %v1458_v30, %v1456_v29  ;;  %v176_v41 = vand.u32 4294901760, %v128_v36  ;;  %v82_v42 = vmul.f32 %v66_v37, %v66_v37  ;;  %v86_v51 = vsel %vm84_vm1, 1.0, %v1328_v50 }
  0x2d   :  { %v83_v44 = vmul.f32 %v67_v38, %v67_v38  ;;  %v1472_v45 = vsub.f32 %v125_v35, %v173_v40  ;;  %v1491_v57 = vsub.f32 %v86_v51, %v86_v51  ;;  %v230_v58 = vand.u32 4294901760, %v1416_v63 }
  0x2e   :  { %v1474_v46 = vsub.f32 %v128_v36, %v176_v41  ;;  %v131_v47 = vsel %vm84_vm1, %v82_v42, 0  ;;  %v1484_v49 = vpack.c.bf16 %v176_v41, %v173_v40  ;;  %v237_v59 = vand.u32 4294901760, %v1418_v2 }
  0x2f   :  { %v134_v48 = vsel %vm84_vm1, %v83_v44, 0  ;;  %v179_v52 = vand.u32 4294901760, %v131_v47  ;;  %v219_v61 = vand.u32 4294901760, %v1491_v57  ;;  %v231_v3 = vsub.f32 %v1416_v63, %v230_v58 }
  0x30   :  { %1120 = vmatpush3.bf16.xpose.msra.mxu1 %v1400_v43  ;;  %1192 = vmatpush3.bf16.xpose.msra.mxu0 %v1400_v43  ;;  %v1179_v4 = vpack.c.bf16 %v1474_v46, %v1472_v45  ;;  %v182_v53 = vand.u32 4294901760, %v134_v48  ;;  %v238_v5 = vsub.f32 %v1418_v2, %v237_v59  ;;  %v244_v12 = vand.u32 4294901760, %v1422_v6 }
  0x31   :  { %1121 = vmatprep.subr.bf16.mxu1 %v1325_v0  ;;  %1193 = vmatprep.subr.bf16.mxu0 %v1325_v0  ;;  %v1487_v54 = vsub.f32 %v131_v47, %v179_v52  ;;  %v220_v9 = vsub.f32 %v1491_v57, %v219_v61  ;;  %v232_v10 = vand.u32 4294901760, %v231_v3  ;;  %v251_v21 = vand.u32 4294901760, %v1424_v7 }
  0x32   :  { %v1489_v55 = vsub.f32 %v134_v48, %v182_v53  ;;  %v1502_v62 = vpack.c.bf16 %v182_v53, %v179_v52  ;;  %v239_v11 = vand.u32 4294901760, %v238_v5  ;;  %v1209_v26 = vpack.c.bf16 %v237_v59, %v230_v58 }
  0x33   :  { %v221_v22 = vand.u32 4294901760, %v220_v9  ;;  %v245_v31 = vsub.f32 %v1422_v6, %v244_v12  ;;  %v252_v33 = vsub.f32 %v1424_v7, %v251_v21  ;;  %v258_v37 = vand.u32 4294901760, %v1426_v8 }
  0x34   :  { %v1182_v60 = vpack.c.bf16 %v1489_v55, %v1487_v54  ;;  %v1137_v24 = vpack.c.bf16 %v239_v11, %v232_v10  ;;  %v265_v38 = vand.u32 4294901760, %v1434_v13  ;;  %v1212_v41 = vpack.c.bf16 %v251_v21, %v244_v12 }
  0x35   :  { %v246_v35 = vand.u32 4294901760, %v245_v31  ;;  %v253_v36 = vand.u32 4294901760, %v252_v33  ;;  %v259_v42 = vsub.f32 %v1426_v8, %v258_v37  ;;  %v272_v50 = vand.u32 4294901760, %v1436_v14 }
  0x36   :  { %v266_v44 = vsub.f32 %v1434_v13, %v265_v38  ;;  %v279_v51 = vand.u32 4294901760, %v1438_v15  ;;  %v1215_v53 = vpack.c.bf16 %v265_v38, %v258_v37  ;;  %v286_v5 = vand.u32 4294901760, %v1440_v16 }
  0x37   :  { %v1140_v40 = vpack.c.bf16 %v253_v36, %v246_v35  ;;  %v260_v47 = vand.u32 4294901760, %v259_v42  ;;  %v273_v58 = vsub.f32 %v1436_v14, %v272_v50  ;;  %v293_v9 = vand.u32 4294901760, %v1444_v18 }
  0x38   :  { %1123 = vmatpush3.bf16.xpose.msra.mxu1 %v1412_v56  ;;  %1195 = vmatpush3.bf16.xpose.msra.mxu0 %v1412_v56  ;;  %v267_v48 = vand.u32 4294901760, %v266_v44  ;;  %v280_v59 = vsub.f32 %v1438_v15, %v279_v51  ;;  %v1218_v11 = vpack.c.bf16 %v279_v51, %v272_v50  ;;  %v287_v12 = vsub.f32 %v1440_v16, %v286_v5 }
  0x39   :  { %1124 = vmatprep.subr.bf16.mxu1 %v1325_v0  ;;  %1196 = vmatprep.subr.bf16.mxu0 %v1325_v0  ;;  %v294_v21 = vsub.f32 %v1444_v18, %v293_v9  ;;  %v307_v31 = vand.u32 4294901760, %v1458_v30  ;;  %v1221_v35 = vpack.c.bf16 %v293_v9, %v286_v5  ;;  %v321_v42 = vand.u32 4294901760, %v1474_v46 }
  0x3a   :  { %v1143_v52 = vpack.c.bf16 %v267_v48, %v260_v47  ;;  %v281_v3 = vand.u32 4294901760, %v280_v59 }
  0x3b   :  { %v308_v37 = vsub.f32 %v1458_v30, %v307_v31  ;;  %v322_v50 = vsub.f32 %v1474_v46, %v321_v42 }
  0x40   :  { %1126 = vmatpush3.bf16.xpose.msra.mxu1 %v1442_v17  ;;  %1198 = vmatpush3.bf16.xpose.msra.mxu0 %v1442_v17 }
  0x41   :  { %1127 = vmatprep.subr.bf16.mxu1 %v1325_v0  ;;  %1199 = vmatprep.subr.bf16.mxu0 %v1325_v0 }
  0x48   :  { %1129 = vmatpush3.bf16.xpose.msra.mxu1 %v1470_v39  ;;  %1201 = vmatpush3.bf16.xpose.msra.mxu0 %v1470_v39 }
  0x49   :  { %1130 = vmatprep.subr.bf16.mxu1 %v1325_v0  ;;  %1202 = vmatprep.subr.bf16.mxu0 %v1325_v0 }
  0x50   :  { %1132 = vmatpush3.bf16.xpose.msra.mxu1 %v1484_v49  ;;  %1204 = vmatpush3.bf16.xpose.msra.mxu0 %v1484_v49 }
  0x51   :  { %1133 = vmatprep.subr.bf16.mxu1 %v1325_v0  ;;  %1205 = vmatprep.subr.bf16.mxu0 %v1325_v0 }
  0x58   :  { %1135 = vmatpush3.bf16.xpose.msra.mxu1 %v1502_v62  ;;  %1207 = vmatpush3.bf16.xpose.msra.mxu0 %v1502_v62 }
  0x59   :  { %1136 = vmatprep.subr.bf16.mxu1 %v1325_v0  ;;  %1208 = vmatprep.subr.bf16.mxu0 %v1325_v0 }
  0x5f   :  { %935 = vmatmul.mubr.f32.vlgmr.msra.gmra.mrb[0].mxu1 %v221_v22  ;;  %1040 = vmatmul.mubr.f32.vlgmr.msra.gmra.mrb[0].mxu0 %v219_v61  ;;  %v274_v61 = vand.u32 4294901760, %v273_v58  ;;  %v288_v22 = vand.u32 4294901760, %v287_v12  ;;  %v335_v58 = vand.u32 4294901760, %v1489_v55 }
  0x60   :  { %1138 = vmatpush3.bf16.xpose.msra.mxu1 %v1137_v24  ;;  %1210 = vmatpush3.bf16.xpose.msra.mxu0 %v1209_v26  ;;  %v295_v24 = vand.u32 4294901760, %v294_v21  ;;  %v300_v26 = vand.u32 4294901760, %v1456_v29  ;;  %v1329_v21 = vmov 1.0  }
  0x61   :  { %1139 = vmatprep.subr.bf16.mxu1 %v1325_v0  ;;  %1211 = vmatprep.subr.bf16.mxu0 %v1325_v0  ;;  %v1146_v10 = vpack.c.bf16 %v281_v3, %v274_v61  ;;  %v336_v5 = vsub.f32 %v1489_v55, %v335_v58 }
  0x62   :  { %969 = vmatprep.mubr.msk.f32.mxu1 %vm1326_vm0, %v1327_v1  ;;  %1074 = vmatprep.mubr.msk.f32.mxu0 %vm1326_vm0, %v1327_v1  ;;  %v1149_v33 = vpack.c.bf16 %v295_v24, %v288_v22  ;;  %v301_v36 = vsub.f32 %v1456_v29, %v300_v26  ;;  %v1224_v47 = vpack.c.bf16 %v307_v31, %v300_v26 }
  0x64   :  { %v302_v38 = vand.u32 4294901760, %v301_v36 }
  0x68   :  { %1141 = vmatpush3.bf16.xpose.msra.mxu1 %v1140_v40  ;;  %1213 = vmatpush3.bf16.xpose.msra.mxu0 %v1212_v41  ;;  %v309_v40 = vand.u32 4294901760, %v308_v37  ;;  %v314_v41 = vand.u32 4294901760, %v1472_v45 }
  0x69   :  { %1142 = vmatprep.subr.bf16.mxu1 %v1325_v0  ;;  %1214 = vmatprep.subr.bf16.mxu0 %v1325_v0 }
  0x6a   :  { %v1152_v44 = vpack.c.bf16 %v309_v40, %v302_v38  ;;  %v315_v48 = vsub.f32 %v1472_v45, %v314_v41  ;;  %v1227_v61 = vpack.c.bf16 %v321_v42, %v314_v41 }
  0x6c   :  { %v316_v51 = vand.u32 4294901760, %v315_v48 }
  0x70   :  { %1144 = vmatpush3.bf16.xpose.msra.mxu1 %v1143_v52  ;;  %1216 = vmatpush3.bf16.xpose.msra.mxu0 %v1215_v53  ;;  %v323_v52 = vand.u32 4294901760, %v322_v50  ;;  %v328_v53 = vand.u32 4294901760, %v1487_v54 }
  0x71   :  { %1145 = vmatprep.subr.bf16.mxu1 %v1325_v0  ;;  %1217 = vmatprep.subr.bf16.mxu0 %v1325_v0 }
  0x72   :  { %v1155_v59 = vpack.c.bf16 %v323_v52, %v316_v51  ;;  %v329_v3 = vsub.f32 %v1487_v54, %v328_v53  ;;  %v1230_v12 = vpack.c.bf16 %v335_v58, %v328_v53 }
  0x74   :  { %v330_v9 = vand.u32 4294901760, %v329_v3 }
  0x78   :  { %1147 = vmatpush3.bf16.xpose.msra.mxu1 %v1146_v10  ;;  %1219 = vmatpush3.bf16.xpose.msra.mxu0 %v1218_v11  ;;  %v337_v10 = vand.u32 4294901760, %v336_v5 }
  0x79   :  { %1148 = vmatprep.subr.bf16.mxu1 %v1325_v0  ;;  %1220 = vmatprep.subr.bf16.mxu0 %v1325_v0 }
  0x7a   :  { %v1158_v11 = vpack.c.bf16 %v337_v10, %v330_v9 }
  0x80   :  { %1150 = vmatpush3.bf16.xpose.msra.mxu1 %v1149_v33  ;;  %1222 = vmatpush3.bf16.xpose.msra.mxu0 %v1221_v35 }
  0x81   :  { %1151 = vmatprep.subr.bf16.mxu1 %v1325_v0  ;;  %1223 = vmatprep.subr.bf16.mxu0 %v1325_v0 }
  0x88   :  { %1153 = vmatpush3.bf16.xpose.msra.mxu1 %v1152_v44  ;;  %1225 = vmatpush3.bf16.xpose.msra.mxu0 %v1224_v47 }
  0x89   :  { %1154 = vmatprep.subr.bf16.mxu1 %v1325_v0  ;;  %1226 = vmatprep.subr.bf16.mxu0 %v1325_v0 }
  0x90   :  { %1156 = vmatpush3.bf16.xpose.msra.mxu1 %v1155_v59  ;;  %1228 = vmatpush3.bf16.xpose.msra.mxu0 %v1227_v61 }
  0x91   :  { %1157 = vmatprep.subr.bf16.mxu1 %v1325_v0  ;;  %1229 = vmatprep.subr.bf16.mxu0 %v1325_v0 }
  0x98   :  { %1159 = vmatpush3.bf16.xpose.msra.mxu1 %v1158_v11  ;;  %1231 = vmatpush3.bf16.xpose.msra.mxu0 %v1230_v12 }
  0x99   :  { %1160 = vmatprep.subr.bf16.mxu1 %v1325_v0  ;;  %1232 = vmatprep.subr.bf16.mxu0 %v1325_v0 }
  0x9f   :  { %970 = vmatmul.mubr.msk.f32.vlgmr.msra.gmra.mrb[0].mxu1 %vm84_vm1, %v1329_v21  ;;  %1075 = vmatmul.mubr.msk.f32.vlgmr.msra.gmra.mrb[0].mxu0 %vm84_vm1, %v1329_v21 }
  0xa0   :  { %1162 = vmatpush3.bf16.xpose.msra.mxu1 %v1161_v19  ;;  %1234 = vmatpush3.bf16.xpose.msra.mxu0 %v1384_v25 }
  0xa1   :  { %1163 = vmatprep.subr.bf16.mxu1 %v1325_v0  ;;  %1235 = vmatprep.subr.bf16.mxu0 %v1325_v0 }
  0xa2   :  { %1004 = vmatprep.mubr.msk.f32.mxu1 %vm1326_vm0, %v1327_v1  ;;  %1109 = vmatprep.mubr.msk.f32.mxu0 %vm1326_vm0, %v1327_v1  ;;  %v777_v1 = vld [vmem:[%s1629_s1] sm:$0x1] }
  0xa3   :  { %vm778_vm2 = vcmp.ge.s32.totalorder %v777_v1, 0 }
  0xa8   :  { %1165 = vmatpush3.bf16.xpose.msra.mxu1 %v1164_v20  ;;  %1237 = vmatpush3.bf16.xpose.msra.mxu0 %v1390_v32 }
  0xa9   :  { %1166 = vmatprep.subr.bf16.mxu1 %v1325_v0  ;;  %1238 = vmatprep.subr.bf16.mxu0 %v1325_v0 }
  0xb0   :  { %1168 = vmatpush3.bf16.xpose.msra.mxu1 %v1167_v23  ;;  %1240 = vmatpush3.bf16.xpose.msra.mxu0 %v1400_v43 }
  0xb1   :  { %1169 = vmatprep.subr.bf16.mxu1 %v1325_v0  ;;  %1241 = vmatprep.subr.bf16.mxu0 %v1325_v0 }
  0xb8   :  { %1171 = vmatpush3.bf16.xpose.msra.mxu1 %v1170_v27  ;;  %1243 = vmatpush3.bf16.xpose.msra.mxu0 %v1412_v56 }
  0xb9   :  { %1172 = vmatprep.subr.bf16.mxu1 %v1325_v0  ;;  %1244 = vmatprep.subr.bf16.mxu0 %v1325_v0 }
  0xc0   :  { %1174 = vmatpush3.bf16.xpose.msra.mxu1 %v1173_v28  ;;  %1246 = vmatpush3.bf16.xpose.msra.mxu0 %v1442_v17 }
  0xc1   :  { %1175 = vmatprep.subr.bf16.mxu1 %v1325_v0  ;;  %1247 = vmatprep.subr.bf16.mxu0 %v1325_v0 }
  0xc8   :  { %1177 = vmatpush3.bf16.xpose.msra.mxu1 %v1176_v34  ;;  %1249 = vmatpush3.bf16.xpose.msra.mxu0 %v1470_v39 }
  0xc9   :  { %1178 = vmatprep.subr.bf16.mxu1 %v1325_v0  ;;  %1250 = vmatprep.subr.bf16.mxu0 %v1325_v0 }
  0xd0   :  { %1180 = vmatpush3.bf16.xpose.msra.mxu1 %v1179_v4  ;;  %1252 = vmatpush3.bf16.xpose.msra.mxu0 %v1484_v49 }
  0xd1   :  { %1181 = vmatprep.subr.bf16.mxu1 %v1325_v0  ;;  %1253 = vmatprep.subr.bf16.mxu0 %v1325_v0 }
  0xd8   :  { %1183 = vmatpush3.bf16.xpose.msra.mxu1 %v1182_v60  ;;  %1255 = vmatpush3.bf16.xpose.msra.mxu0 %v1502_v62 }
  0xdf   :  { %1005 = vmatmul.mubr.f32.vlgmr.msra.gmra.mrb[0].mxu1 %v1491_v57  ;;  %1110 = vmatmul.mubr.msk.f32.vlgmr.msra.gmra.mrb[0].mxu0 %vm84_vm1, %v1329_v21 }
 0x1b2   :  { %v478_v25 = vpop.f32.mrb[0].mxu1  ;;  %v773_v32 = vpop.f32.mrb[0].mxu0 }
 0x1b3   :  { %v1256_v0 = vadd.f32 %v773_v32, %v478_v25  ;;  %v1006_v43 = vpop.f32.mrb[1].mxu1  ;;  %v1111_v56 = vpop.f32.mrb[1].mxu0 }
 0x1b5   :  { %v779_v63 = vsel %vm778_vm2, %v1256_v0, 0.0 }
 0x1b6   :  { %780 = vst [vmem:[#allocation5] sm:$0x1] %v779_v63 }
 0x1b7   :  { %1307 = shalt.err (!%p1304_p12)
}
 0x1b8   :  { %s1308_s7 = scalar_lea.hbm %s1631_s3, 16 }
 0x1b9   :  { %p1309_p13 = scmp.ne.s32.totalorder %s1631_s3, %s1308_s7  ;;  %p1312_p0 = scmp.lt.u32.totalorder %s1308_s7, %s1631_s3 }
 0x1bb   :  { %p1314_p1 = pnand %p1312_p0, %p1309_p13 }
 0x1bd   :  { %1317 = shalt.err (!%p1314_p1)
}
 0x1be   :  { %790 = dma.vmem_to_hbm [thread:$0]  %s788_s30, 16, %s1631_s3, [#allocation4]  }
 0x1bf   :  { %1320 = dma.done.wait [#allocation4], 16  }
 0x1c0   :  { %1321 = vsyncadd [#allocation4], 4294967280 }
 0x1c1   :  { %794 = vsyncpa [#allocation3], 1 }
 0x1c2   :  { %795 = vsyncpa [#allocation4], 1 }

</bundles_post_ra>
